<compile_context>
chip_gen: v6e
topology: v6e:2x2x1
jax: 0.10.0
libtpu: 0.0.40
codegen_flags: <defaults>
</compile_context>

<pallas_src>
import functools

import jax
import jax.numpy as jnp
from jax.experimental import pallas as pl
from jax.experimental.pallas import tpu as pltpu


_LAYER_WIDTHS = (256, 128, 64, 32)  # hidden widths between input_size and num_classes
_NUM_LAYERS = 5


def _round_up(x, m):
    return (x + m - 1) // m * m


def _leaky_relu(x, slope=0.01):
    return jnp.where(x > 0, x, slope * x)


def _padded_dims(input_size, num_classes):
    dims = [input_size, *_LAYER_WIDTHS, num_classes]
    return dims, [_round_up(d, 128) for d in dims]


def _mlp_kernel(x_ref, w_ref, b_ref, o_ref, *, k_pads, n_pads):
    # x_ref : (TM, k_pads[0])   bf16  zero-padded activations (batch tile)
    # w_ref : (L, PAD, PAD)     bf16  zero-padded weight slab, resident in VMEM
    # b_ref : (L, 1, PAD)       f32   zero-padded biases (last-layer pad = -1e9)
    # o_ref : (TM, n_pads[-1])  f32   lane-dense softmax output
    num_layers = len(k_pads)
    h = x_ref[...]  # bf16, width == k_pads[0]
    logits = None
    for l in range(num_layers):  # static unroll
        kp, np_ = k_pads[l], n_pads[l]
        # Only the live, 128-aligned sub-block of the padded slab (tile-aligned
        # ref views are free); accumulate in f32 on the MXU.
        acc = jnp.dot(h, w_ref[l, :kp, :np_], preferred_element_type=jnp.float32)
        acc = acc + b_ref[l, :, :np_]  # f32 bias add
        if l < num_layers - 1:
            acc = _leaky_relu(acc)  # f32 elementwise
            # TODO(synk): dropout is identity (eval mode); no random masking here.
            h = acc.astype(jnp.bfloat16)  # bf16 MXU input for next layer
        else:
            logits = acc

    # Exact softmax. Padded class lanes carry a -1e9 bias sentinel, so exp()
    # sends them to exactly 0 and rows sum to 1 to f32 precision.
    m = jnp.max(logits, axis=-1, keepdims=True)
    e = jnp.exp(logits - m)
    denom = jnp.sum(e, axis=-1, keepdims=True)
    o_ref[...] = (e / denom).astype(o_ref.dtype)


def pack_params(params, input_size, num_classes):
    """Pack per-layer (in,out) weights / (1,out) biases into two padded slabs."""
    dims, pdims = _padded_dims(input_size, num_classes)
    pad = max(pdims)
    w_slab = jnp.zeros((_NUM_LAYERS, pad, pad), jnp.bfloat16)
    b_slab = jnp.zeros((_NUM_LAYERS, 1, pad), jnp.float32)
    for l in range(_NUM_LAYERS):
        fi, fo = dims[l], dims[l + 1]
        w_slab = w_slab.at[l, :fi, :fo].set(params[f"w{l + 1}"].astype(jnp.bfloat16))
        b_slab = b_slab.at[l, 0, :fo].set(params[f"b{l + 1}"][0].astype(jnp.float32))
    # Sentinel: padded class lanes of the last layer vanish under softmax.
    b_slab = b_slab.at[_NUM_LAYERS - 1, 0, num_classes:].set(-1e9)
    return w_slab, b_slab


def cirosis_cnn_forward(x, w_slab, b_slab, num_classes, *, tile_m=1024):
    """x: (B, input_size) f32. Returns (B, num_classes) f32 softmax probabilities."""
    b, input_size = x.shape
    n_layers, pad, _ = w_slab.shape
    _, pdims = _padded_dims(input_size, num_classes)
    k_pads = tuple(pdims[:-1])
    n_pads = tuple(pdims[1:])
    in_pad = k_pads[0]    # e.g. 128 for input_size=32
    out_pad = n_pads[-1]  # e.g. 128 for num_classes=4

    # Batch tile: 16-aligned (bf16 sublane packing); for batches that need
    # tiling, 256-aligned and chosen so the grid has >= 2 steps (keeps both
    # v7x TensorCores busy), capped at tile_m.
    if b <= 256:
        tm = _round_up(b, 16)
    else:
        tm = min(tile_m, _round_up(pl.cdiv(b, 2), 256))
    tm = max(16, _round_up(tm, 16))
    b_padded = _round_up(b, tm)
    grid = (b_padded // tm,)

    # Pad batch rows and input features to 128 bf16 lanes only.
    x_p = jnp.zeros((b_padded, in_pad), jnp.bfloat16)
    x_p = x_p.at[:b, :input_size].set(x.astype(jnp.bfloat16))

    # Advisory cost estimate: padded FLOPs / bytes actually executed.
    flops = 2 * b_padded * sum(k_pads[l] * n_pads[l] for l in range(n_layers))
    bytes_accessed = (
        x_p.size * 2 + w_slab.size * 2 + b_slab.size * 4 + b_padded * out_pad * 4
    )
    cost = pl.CostEstimate(
        flops=int(flops),
        transcendentals=int(b_padded * out_pad),
        bytes_accessed=int(bytes_accessed),
    )

    kernel = functools.partial(_mlp_kernel, k_pads=k_pads, n_pads=n_pads)

    out_padded = pl.pallas_call(
        kernel,
        out_shape=jax.ShapeDtypeStruct((b_padded, out_pad), jnp.float32),
        grid=grid,
        in_specs=[
            # Activations: batch-tiled, 128 bf16 lanes.
            pl.BlockSpec((tm, in_pad), lambda i: (i, 0)),
            # Weight slab: grid-invariant -> resident, single-buffered.
            pl.BlockSpec((n_layers, pad, pad), lambda i: (0, 0, 0),
                         pipeline_mode=pl.Buffered(1)),
            # Bias slab: grid-invariant -> resident, single-buffered.
            pl.BlockSpec((n_layers, 1, pad), lambda i: (0, 0, 0),
                         pipeline_mode=pl.Buffered(1)),
        ],
        out_specs=pl.BlockSpec((tm, out_pad), lambda i: (i, 0)),  # lane-dense
        compiler_params=pltpu.CompilerParams(dimension_semantics=("parallel",)),
        cost_estimate=cost,
    )(x_p, w_slab, b_slab)

    return out_padded[:b, :num_classes]


def init_params(key, input_size, num_classes):
    """Deterministic init mimicking nn.Linear (uniform +-1/sqrt(fan_in)).
    Weights stored transposed: (in, out). Biases stored as (1, out)."""
    dims = [input_size, *_LAYER_WIDTHS, num_classes]
    params = {}
    for i in range(_NUM_LAYERS):
        fan_in, fan_out = dims[i], dims[i + 1]
        key, kw, kb = jax.random.split(key, 3)
        bound = 1.0 / (fan_in ** 0.5)
        params[f"w{i + 1}"] = jax.random.uniform(
            kw, (fan_in, fan_out), jnp.float32, -bound, bound
        )
        params[f"b{i + 1}"] = jax.random.uniform(
            kb, (1, fan_out), jnp.float32, -bound, bound
        )
    return params


def reference_forward(x, params):
    """Pure-JAX reference with matching numerics: bf16 matmul inputs, f32 accumulate."""
    h = x
    for i in range(1, _NUM_LAYERS):
        h = jnp.dot(
            h.astype(jnp.bfloat16),
            params[f"w{i}"].astype(jnp.bfloat16),
            preferred_element_type=jnp.float32,
        ) + params[f"b{i}"]
        h = jnp.where(h > 0, h, 0.01 * h)
    logits = jnp.dot(
        h.astype(jnp.bfloat16),
        params["w5"].astype(jnp.bfloat16),
        preferred_element_type=jnp.float32,
    ) + params["b5"]
    return jax.nn.softmax(logits, axis=1)


if __name__ == "__main__":
    input_size = 32
    num_classes = 4

    key = jax.random.PRNGKey(0)
    key, kx1, kx2 = jax.random.split(key, 3)
    params = init_params(key, input_size, num_classes)
    w_slab, b_slab = pack_params(params, input_size, num_classes)

    # Small batch: single grid step (block == full padded array).
    x_small = jax.random.normal(kx1, (8, input_size), jnp.float32)
    out_small = jax.block_until_ready(
        cirosis_cnn_forward(x_small, w_slab, b_slab, num_classes)
    )
    ref_small = reference_forward(x_small, params)
    assert out_small.shape == (8, num_classes)
    assert jnp.allclose(out_small, ref_small, atol=2e-3, rtol=2e-3), "small-batch mismatch"
    assert jnp.allclose(jnp.sum(out_small, axis=1), 1.0, atol=2e-3), "rows must sum to 1"

    # Larger ragged batch: exercises the 2-step batch-tiled ("parallel") grid path.
    x_big = jax.random.normal(kx2, (300, input_size), jnp.float32)
    out_big = jax.block_until_ready(
        cirosis_cnn_forward(x_big, w_slab, b_slab, num_classes)
    )
    ref_big = reference_forward(x_big, params)
    assert out_big.shape == (300, num_classes)
    assert jnp.allclose(out_big, ref_big, atol=2e-3, rtol=2e-3), "tiled-batch mismatch"
    assert jnp.allclose(jnp.sum(out_big, axis=1), 1.0, atol=2e-3), "rows must sum to 1"

    print("KERNEL_OK")
</pallas_src>

<mosaic_0001>
module attributes {stable_mosaic.version = 11 : i64} {
  func.func @_mlp_kernel(%arg0: i32, %arg1: memref<16x128xbf16, #tpu.memory_space<vmem>>, %arg2: memref<5x256x256xbf16, #tpu.memory_space<vmem>>, %arg3: memref<5x1x256xf32, #tpu.memory_space<vmem>>, %arg4: memref<16x128xf32, #tpu.memory_space<vmem>>) attributes {dimension_semantics = [#tpu.dimension_semantics<parallel>], iteration_bounds = array<i64: 1>, scalar_prefetch = 0 : i64, scratch_operands = 0 : i64, tpu.core_type = #tpu.core_type<tc>, window_params = [{transform_indices = @transform_0, window_bounds = array<i64: 16, 128>}, {pipeline_mode = #tpu.pipeline_mode<synchronous>, transform_indices = @transform_1, window_bounds = array<i64: 5, 256, 256>}, {pipeline_mode = #tpu.pipeline_mode<synchronous>, transform_indices = @transform_2, window_bounds = array<i64: 5, 1, 256>}, {transform_indices = @transform_3, window_bounds = array<i64: 16, 128>}]} {
    %c0 = arith.constant 0 : index
    %c0_0 = arith.constant 0 : index
    %0 = vector.load %arg1[%c0, %c0_0] : memref<16x128xbf16, #tpu.memory_space<vmem>>, vector<16x128xbf16>
    %c0_1 = arith.constant 0 : index
    %c0_2 = arith.constant 0 : index
    %c0_3 = arith.constant 0 : index
    %1 = vector.load %arg2[%c0_1, %c0_2, %c0_3] : memref<5x256x256xbf16, #tpu.memory_space<vmem>>, vector<1x128x256xbf16>
    %2 = vector.shape_cast %1 : vector<1x128x256xbf16> to vector<128x256xbf16>
    %cst = arith.constant dense<0.000000e+00> : vector<16x256xf32>
    %3 = tpu.matmul %0, %2, %cst {dimension_numbers = #tpu.dot_dimension_numbers<[1], [0], [0], [1], [0, 0, 1, 1], [], []>} : vector<16x128xbf16>, vector<128x256xbf16>, vector<16x256xf32> -> vector<16x256xf32>
    %c0_4 = arith.constant 0 : index
    %c0_5 = arith.constant 0 : index
    %c0_6 = arith.constant 0 : index
    %4 = vector.load %arg3[%c0_4, %c0_5, %c0_6] : memref<5x1x256xf32, #tpu.memory_space<vmem>>, vector<1x1x256xf32>
    %5 = vector.shape_cast %4 : vector<1x1x256xf32> to vector<1x256xf32>
    %6 = vector.broadcast %5 : vector<1x256xf32> to vector<16x256xf32>
    %7 = arith.addf %3, %6 : vector<16x256xf32>
    %cst_7 = arith.constant 0.000000e+00 : f32
    %8 = vector.broadcast %cst_7 : f32 to vector<16x256xf32>
    %9 = arith.cmpf ogt, %7, %8 : vector<16x256xf32>
    %cst_8 = arith.constant 0.00999999977 : f32
    %10 = vector.broadcast %cst_8 : f32 to vector<16x256xf32>
    %11 = arith.mulf %10, %7 : vector<16x256xf32>
    %12 = arith.select %9, %7, %11 : vector<16x256xi1>, vector<16x256xf32>
    %13 = arith.truncf %12 : vector<16x256xf32> to vector<16x256xbf16>
    %c1 = arith.constant 1 : index
    %c0_9 = arith.constant 0 : index
    %c0_10 = arith.constant 0 : index
    %14 = vector.load %arg2[%c1, %c0_9, %c0_10] : memref<5x256x256xbf16, #tpu.memory_space<vmem>>, vector<1x256x128xbf16>
    %15 = vector.shape_cast %14 : vector<1x256x128xbf16> to vector<256x128xbf16>
    %cst_11 = arith.constant dense<0.000000e+00> : vector<16x128xf32>
    %16 = tpu.matmul %13, %15, %cst_11 {dimension_numbers = #tpu.dot_dimension_numbers<[1], [0], [0], [1], [0, 0, 1, 1], [], []>} : vector<16x256xbf16>, vector<256x128xbf16>, vector<16x128xf32> -> vector<16x128xf32>
    %c1_12 = arith.constant 1 : index
    %c0_13 = arith.constant 0 : index
    %c0_14 = arith.constant 0 : index
    %17 = vector.load %arg3[%c1_12, %c0_13, %c0_14] : memref<5x1x256xf32, #tpu.memory_space<vmem>>, vector<1x1x128xf32>
    %18 = vector.shape_cast %17 : vector<1x1x128xf32> to vector<1x128xf32>
    %19 = vector.broadcast %18 : vector<1x128xf32> to vector<16x128xf32>
    %20 = arith.addf %16, %19 : vector<16x128xf32>
    %cst_15 = arith.constant 0.000000e+00 : f32
    %21 = vector.broadcast %cst_15 : f32 to vector<16x128xf32>
    %22 = arith.cmpf ogt, %20, %21 : vector<16x128xf32>
    %cst_16 = arith.constant 0.00999999977 : f32
    %23 = vector.broadcast %cst_16 : f32 to vector<16x128xf32>
    %24 = arith.mulf %23, %20 : vector<16x128xf32>
    %25 = arith.select %22, %20, %24 : vector<16x128xi1>, vector<16x128xf32>
    %26 = arith.truncf %25 : vector<16x128xf32> to vector<16x128xbf16>
    %c2 = arith.constant 2 : index
    %c0_17 = arith.constant 0 : index
    %c0_18 = arith.constant 0 : index
    %27 = vector.load %arg2[%c2, %c0_17, %c0_18] : memref<5x256x256xbf16, #tpu.memory_space<vmem>>, vector<1x128x128xbf16>
    %28 = vector.shape_cast %27 : vector<1x128x128xbf16> to vector<128x128xbf16>
    %cst_19 = arith.constant dense<0.000000e+00> : vector<16x128xf32>
    %29 = tpu.matmul %26, %28, %cst_19 {dimension_numbers = #tpu.dot_dimension_numbers<[1], [0], [0], [1], [0, 0, 1, 1], [], []>} : vector<16x128xbf16>, vector<128x128xbf16>, vector<16x128xf32> -> vector<16x128xf32>
    %c2_20 = arith.constant 2 : index
    %c0_21 = arith.constant 0 : index
    %c0_22 = arith.constant 0 : index
    %30 = vector.load %arg3[%c2_20, %c0_21, %c0_22] : memref<5x1x256xf32, #tpu.memory_space<vmem>>, vector<1x1x128xf32>
    %31 = vector.shape_cast %30 : vector<1x1x128xf32> to vector<1x128xf32>
    %32 = vector.broadcast %31 : vector<1x128xf32> to vector<16x128xf32>
    %33 = arith.addf %29, %32 : vector<16x128xf32>
    %cst_23 = arith.constant 0.000000e+00 : f32
    %34 = vector.broadcast %cst_23 : f32 to vector<16x128xf32>
    %35 = arith.cmpf ogt, %33, %34 : vector<16x128xf32>
    %cst_24 = arith.constant 0.00999999977 : f32
    %36 = vector.broadcast %cst_24 : f32 to vector<16x128xf32>
    %37 = arith.mulf %36, %33 : vector<16x128xf32>
    %38 = arith.select %35, %33, %37 : vector<16x128xi1>, vector<16x128xf32>
    %39 = arith.truncf %38 : vector<16x128xf32> to vector<16x128xbf16>
    %c3 = arith.constant 3 : index
    %c0_25 = arith.constant 0 : index
    %c0_26 = arith.constant 0 : index
    %40 = vector.load %arg2[%c3, %c0_25, %c0_26] : memref<5x256x256xbf16, #tpu.memory_space<vmem>>, vector<1x128x128xbf16>
    %41 = vector.shape_cast %40 : vector<1x128x128xbf16> to vector<128x128xbf16>
    %cst_27 = arith.constant dense<0.000000e+00> : vector<16x128xf32>
    %42 = tpu.matmul %39, %41, %cst_27 {dimension_numbers = #tpu.dot_dimension_numbers<[1], [0], [0], [1], [0, 0, 1, 1], [], []>} : vector<16x128xbf16>, vector<128x128xbf16>, vector<16x128xf32> -> vector<16x128xf32>
    %c3_28 = arith.constant 3 : index
    %c0_29 = arith.constant 0 : index
    %c0_30 = arith.constant 0 : index
    %43 = vector.load %arg3[%c3_28, %c0_29, %c0_30] : memref<5x1x256xf32, #tpu.memory_space<vmem>>, vector<1x1x128xf32>
    %44 = vector.shape_cast %43 : vector<1x1x128xf32> to vector<1x128xf32>
    %45 = vector.broadcast %44 : vector<1x128xf32> to vector<16x128xf32>
    %46 = arith.addf %42, %45 : vector<16x128xf32>
    %cst_31 = arith.constant 0.000000e+00 : f32
    %47 = vector.broadcast %cst_31 : f32 to vector<16x128xf32>
    %48 = arith.cmpf ogt, %46, %47 : vector<16x128xf32>
    %cst_32 = arith.constant 0.00999999977 : f32
    %49 = vector.broadcast %cst_32 : f32 to vector<16x128xf32>
    %50 = arith.mulf %49, %46 : vector<16x128xf32>
    %51 = arith.select %48, %46, %50 : vector<16x128xi1>, vector<16x128xf32>
    %52 = arith.truncf %51 : vector<16x128xf32> to vector<16x128xbf16>
    %c4 = arith.constant 4 : index
    %c0_33 = arith.constant 0 : index
    %c0_34 = arith.constant 0 : index
    %53 = vector.load %arg2[%c4, %c0_33, %c0_34] : memref<5x256x256xbf16, #tpu.memory_space<vmem>>, vector<1x128x128xbf16>
    %54 = vector.shape_cast %53 : vector<1x128x128xbf16> to vector<128x128xbf16>
    %cst_35 = arith.constant dense<0.000000e+00> : vector<16x128xf32>
    %55 = tpu.matmul %52, %54, %cst_35 {dimension_numbers = #tpu.dot_dimension_numbers<[1], [0], [0], [1], [0, 0, 1, 1], [], []>} : vector<16x128xbf16>, vector<128x128xbf16>, vector<16x128xf32> -> vector<16x128xf32>
    %c4_36 = arith.constant 4 : index
    %c0_37 = arith.constant 0 : index
    %c0_38 = arith.constant 0 : index
    %56 = vector.load %arg3[%c4_36, %c0_37, %c0_38] : memref<5x1x256xf32, #tpu.memory_space<vmem>>, vector<1x1x128xf32>
    %57 = vector.shape_cast %56 : vector<1x1x128xf32> to vector<1x128xf32>
    %58 = vector.broadcast %57 : vector<1x128xf32> to vector<16x128xf32>
    %59 = arith.addf %55, %58 : vector<16x128xf32>
    %cst_39 = arith.constant dense<0xFF800000> : vector<16xf32>
    %60 = vector.multi_reduction <maximumf>, %59, %cst_39 [1] : vector<16x128xf32> to vector<16xf32>
    %61 = vector.shape_cast %60 : vector<16xf32> to vector<16x1xf32>
    %62 = vector.broadcast %61 : vector<16x1xf32> to vector<16x128xf32>
    %63 = arith.subf %59, %62 : vector<16x128xf32>
    %64 = math.exp %63 : vector<16x128xf32>
    %cst_40 = arith.constant dense<0.000000e+00> : vector<16xf32>
    %65 = vector.multi_reduction <add>, %64, %cst_40 [1] : vector<16x128xf32> to vector<16xf32>
    %66 = vector.shape_cast %65 : vector<16xf32> to vector<16x1xf32>
    %67 = vector.broadcast %66 : vector<16x1xf32> to vector<16x128xf32>
    %68 = arith.divf %64, %67 : vector<16x128xf32>
    %c0_41 = arith.constant 0 : index
    %c0_42 = arith.constant 0 : index
    %69 = vector.load %arg4[%c0_41, %c0_42] : memref<16x128xf32, #tpu.memory_space<vmem>>, vector<16x128xf32>
    tpu.vector_store %arg4[%c0_41, %c0_42], %68 {strides = array<i32>} : memref<16x128xf32, #tpu.memory_space<vmem>>, vector<16x128xf32>,
    return
  }
  func.func @transform_0(%arg0: i32) -> (i32, i32) {
    %c0_i32 = arith.constant 0 : i32
    %c0_i32_0 = arith.constant 0 : i32
    return %arg0, %c0_i32 : i32, i32
  }
  func.func @transform_1(%arg0: i32) -> (i32, i32, i32) {
    %c0_i32 = arith.constant 0 : i32
    %c0_i32_0 = arith.constant 0 : i32
    %c0_i32_1 = arith.constant 0 : i32
    %c0_i32_2 = arith.constant 0 : i32
    return %c0_i32, %c0_i32_0, %c0_i32_1 : i32, i32, i32
  }
  func.func @transform_2(%arg0: i32) -> (i32, i32, i32) {
    %c0_i32 = arith.constant 0 : i32
    %c0_i32_0 = arith.constant 0 : i32
    %c0_i32_1 = arith.constant 0 : i32
    %c0_i32_2 = arith.constant 0 : i32
    return %c0_i32, %c0_i32_0, %c0_i32_1 : i32, i32, i32
  }
  func.func @transform_3(%arg0: i32) -> (i32, i32) {
    %c0_i32 = arith.constant 0 : i32
    %c0_i32_0 = arith.constant 0 : i32
    return %arg0, %c0_i32 : i32, i32
  }
}

</mosaic_0001>

<bundles_post_ra>
// kernel: tpu_custom_call.1
= control target key start
LH: loop header
LB: loop body
LE: loop exit
PB: predicated region body
PF: predicated region fallthrough
CT: control target
= control target key end

     0   :  { %8 = vsyncpa [#allocation3], 0  ;;  %s1232_s0 = inlined_call_operand.hbm [shape: bf16[16,128], index: 0, kind: input, shape index: {}]   ;;  %s1233_s1 = inlined_call_operand.hbm [shape: bf16[5,256,256], index: 1, kind: input, shape index: {}]   ;;  %s1234_s2 = inlined_call_operand.hbm [shape: f32[5,1,256], index: 2, kind: input, shape index: {}]   ;;  %s1235_s3 = inlined_call_operand.hbm [shape: f32[16,128], index: 3, kind: output, shape index: {}]  }
   0x1   :  { %9 = vsyncpa [#allocation6], 0 }
   0x2   :  { %10 = vsyncpa [#allocation4], 0  ;;  %s1151_s12 = smov [#allocation5]  }
   0x3   :  { %s28_s13 = sshll.u32 %s1151_s12, 4  ;;  %s29_s13 = int_to_ptr.vmem [resolvable:$true] %s28_s13 }
   0x4   :  { %s1073_s14 = scalar_lea.vmem %s29_s13, 20480  ;;  %p1078_p1 = scmp.lt.s32.totalorder %s29_s13, %s29_s13 }
   0x5   :  { %p1074_p0 = scmp.ne.s32.totalorder %s29_s13, %s1073_s14  ;;  %p1079_p2 = scmp.lt.s32.totalorder %s1073_s14, %s1073_s14 }
   0x7   :  { %p1080_p3 = por %p1079_p2, %p1078_p1 }
   0x9   :  { %p1081_p4 = pnand %p1080_p3, %p1074_p0 }
   0xb   :  { %1084 = shalt.err (!%p1081_p4)
}
   0xc   :  { %s1152_s15 = smov 128   ;;  %s1153_s16 = smov 8  }
   0xd   :  { %34 = dma.hbm_to_vmem [thread:$0]  %s1233_s1, 20480, %s29_s13, [#allocation6], %s1152_s15, %s1152_s15, %s1153_s16  }
   0xe   :  { %s1154_s19 = smov [#allocation2]  }
   0xf   :  { %s16_s20 = sshll.u32 %s1154_s19, 4  ;;  %s17_s20 = int_to_ptr.vmem [resolvable:$true] %s16_s20 }
  0x10   :  { %s1093_s21 = scalar_lea.vmem %s17_s20, 128  ;;  %p1098_p6 = scmp.lt.s32.totalorder %s17_s20, %s17_s20 }
  0x11   :  { %p1094_p5 = scmp.ne.s32.totalorder %s17_s20, %s1093_s21  ;;  %p1099_p7 = scmp.lt.s32.totalorder %s1093_s21, %s1093_s21 }
  0x13   :  { %p1100_p8 = por %p1099_p7, %p1098_p6 }
  0x15   :  { %p1101_p9 = pnand %p1100_p8, %p1094_p5 }
  0x17   :  { %1104 = shalt.err (!%p1101_p9)
}
  0x18   :  { %s1155_s22 = smov 64   ;;  %s1156_s23 = smov 4  }
  0x19   :  { %22 = dma.hbm_to_vmem [thread:$0]  %s1232_s0, 128, %s17_s20, [#allocation3], %s1155_s22, %s1155_s22, %s1156_s23  }
  0x1a   :  { %s1157_s26 = smov [#allocation7]  }
  0x1b   :  { %s40_s27 = sshll.u32 %s1157_s26, 4  ;;  %s41_s27 = int_to_ptr.vmem [resolvable:$true] %s40_s27 }
  0x1c   :  { %s1113_s1 = scalar_lea.vmem %s41_s27, 160  ;;  %p1118_p11 = scmp.lt.s32.totalorder %s41_s27, %s41_s27 }
  0x1d   :  { %p1114_p10 = scmp.ne.s32.totalorder %s41_s27, %s1113_s1  ;;  %p1119_p12 = scmp.lt.s32.totalorder %s1113_s1, %s1113_s1 }
  0x1f   :  { %p1120_p13 = por %p1119_p12, %p1118_p11 }
  0x21   :  { %p1121_p0 = pnand %p1120_p13, %p1114_p10 }
  0x23   :  { %1124 = shalt.err (!%p1121_p0)
}
  0x24   :  { %s1158_s28 = smov 32   ;;  %s1159_s29 = smov 2  }
  0x25   :  { %46 = dma.hbm_to_vmem [thread:$0]  %s1234_s2, 160, %s41_s27, [#allocation6], %s1158_s28, %s1158_s28, %s1159_s29  }
  0x26   :  { %1145 = dma.done.wait [#allocation3], 128  }
  0x27   :  { %1146 = vsyncadd [#allocation3], 4294967168 }
  0x28   :  { %1147 = dma.done.wait [#allocation6], 20640  }
  0x29   :  { %1148 = vsyncadd [#allocation6], 4294946656  ;;  %v1160_v0 = vmov 0   ;;  %v992_v1 = vld [vmem:[#allocation5 + $0x74] ss:$8 sps:$4 sm:$0xff]   ;;  %v1161_v35 = vmov 0.0   ;;  %v77_v39 = vlaneseq }
  0x2a   :  { %205 = vmatprep.mubr.bf16.mxu0 %v1160_v0  ;;  %v994_v2 = vld [vmem:[#allocation5 + $0x70] ss:$8 sps:$4 sm:$0xff]   ;;  %173 = vmatprep.subr.bf16.mxu0 %v992_v1  ;;  %v995_v3 = vld [vmem:[#allocation5 + $0x64] ss:$8 sps:$4 sm:$0xff]   ;;  %v997_v4 = vld [vmem:[#allocation5 + $0x60] ss:$8 sps:$4 sm:$0xff]  }
  0x2b   :  { %174 = vmatpush1.bf16.msra.mxu0 %v994_v2  ;;  %v998_v5 = vld [vmem:[#allocation5 + $0x54] ss:$8 sps:$4 sm:$0xff]   ;;  %v1000_v6 = vld [vmem:[#allocation5 + $0x50] ss:$8 sps:$4 sm:$0xff]   ;;  %v1001_v7 = vld [vmem:[#allocation5 + $0x44] ss:$8 sps:$4 sm:$0xff]  }
  0x2c   :  { %175 = vmatprep.subr.bf16.mxu0 %v995_v3  ;;  %v1003_v8 = vld [vmem:[#allocation5 + $0x40] ss:$8 sps:$4 sm:$0xff]   ;;  %v1004_v9 = vld [vmem:[#allocation5 + $0x34] ss:$8 sps:$4 sm:$0xff]   ;;  %v1017_v10 = vld [vmem:[#allocation5 + $0x1f0] ss:$8 sps:$4 sm:$0xff]  }
  0x2d   :  { %v1006_v11 = vld [vmem:[#allocation5 + $0x30] ss:$8 sps:$4 sm:$0xff]   ;;  %v1007_v13 = vld [vmem:[#allocation5 + $0x24] ss:$8 sps:$4 sm:$0xff]   ;;  %870 = vmatprep.subr.bf16.mxu1 %v1017_v10  ;;  %v1019_v14 = vld [vmem:[#allocation5 + $0x1e0] ss:$8 sps:$4 sm:$0xff]  }
  0x2e   :  { %v1018_v12 = vld [vmem:[#allocation5 + $0x170] ss:$8 sps:$4 sm:$0xff]   ;;  %v1020_v15 = vld [vmem:[#allocation5 + $0x160] ss:$8 sps:$4 sm:$0xff]   ;;  %v1010_v19 = vld [vmem:[#allocation5 + $0x14] ss:$8 sps:$4 sm:$0xff]  }
  0x2f   :  { %176 = vmatpush1.bf16.msra.mxu0 %v997_v4  ;;  %871 = vmatpush3.bf16.msra.mxu1 %v1018_v12  ;;  %v1021_v16 = vld [vmem:[#allocation5 + $0x1d0] ss:$8 sps:$4 sm:$0xff]   ;;  %v1009_v17 = vld [vmem:[#allocation5 + $0x20] ss:$8 sps:$4 sm:$0xff]   ;;  %v1013_v23 = vld [vmem:[#allocation5 + $0x4] ss:$8 sps:$4 sm:$0xff]  }
  0x30   :  { %177 = vmatprep.subr.bf16.mxu0 %v998_v5  ;;  %872 = vmatprep.subr.bf16.mxu1 %v1019_v14  ;;  %v1022_v18 = vld [vmem:[#allocation5 + $0x150] ss:$8 sps:$4 sm:$0xff]   ;;  %v1023_v20 = vld [vmem:[#allocation5 + $0x1c0] ss:$8 sps:$4 sm:$0xff]   ;;  %v78_v40 = vshrl.u32 %v77_v39, 7  ;;  %vm1162_vm4 = vmmov 0  }
  0x31   :  { %v1012_v21 = vld [vmem:[#allocation5 + $0x10] ss:$8 sps:$4 sm:$0xff]   ;;  %v1024_v22 = vld [vmem:[#allocation5 + $0x140] ss:$8 sps:$4 sm:$0xff]   ;;  %s1163_s0 = smov [#allocation8]  }
  0x32   :  { %v1025_v24 = vld [vmem:[#allocation5 + $0x1b0] ss:$8 sps:$4 sm:$0xff]   ;;  %v1015_v25 = vld [vmem:[#allocation5] ss:$8 sps:$4 sm:$0xff]   ;;  %v83_v41 = vsub.s32 1, %v78_v40  ;;  %v79_v42 = vsub.s32 0, %v78_v40 }
  0x33   :  { %178 = vmatpush1.bf16.msra.mxu0 %v1000_v6  ;;  %873 = vmatpush3.bf16.msra.mxu1 %v1020_v15  ;;  %v1016_v26 = vld [vmem:[#allocation2] sm:$0xff]   ;;  %v1027_v28 = vld [vmem:[#allocation5 + $0x1a0] ss:$8 sps:$4 sm:$0xff]   ;;  %s796_s2 = sshll.u32 %s1163_s0, 4  ;;  %s797_s2 = int_to_ptr.vmem [resolvable:$true] %s796_s2 }
  0x34   :  { %179 = vmatprep.subr.bf16.mxu0 %v1001_v7  ;;  %874 = vmatprep.subr.bf16.mxu1 %v1021_v16  ;;  %v1026_v27 = vld [vmem:[#allocation5 + $0x130] ss:$8 sps:$4 sm:$0xff]   ;;  %v1028_v29 = vld [vmem:[#allocation5 + $0x120] ss:$8 sps:$4 sm:$0xff]   ;;  %s1125_s5 = scalar_lea.vmem %s797_s2, 256  ;;  %p1130_p2 = scmp.lt.s32.totalorder %s797_s2, %s797_s2 }
  0x35   :  { %v1029_v30 = vld [vmem:[#allocation5 + $0x190] ss:$8 sps:$4 sm:$0xff]   ;;  %v1031_v32 = vld [vmem:[#allocation5 + $0x180] ss:$8 sps:$4 sm:$0xff]   ;;  %p1126_p1 = scmp.ne.s32.totalorder %s797_s2, %s1125_s5  ;;  %p1131_p3 = scmp.lt.s32.totalorder %s1125_s5, %s1125_s5 }
  0x36   :  { %v1030_v31 = vld [vmem:[#allocation5 + $0x110] ss:$8 sps:$4 sm:$0xff]   ;;  %v1032_v33 = vld [vmem:[#allocation5 + $0x100] ss:$8 sps:$4 sm:$0xff]  }
  0x37   :  { %180 = vmatpush1.bf16.msra.mxu0 %v1003_v8  ;;  %875 = vmatpush3.bf16.msra.mxu1 %v1022_v18  ;;  %v1033_v34 = vld [vmem:[#allocation5 + $0x270] ss:$8 sps:$4 sm:$0xff]   ;;  %v1034_v36 = vld [vmem:[#allocation5 + $0x260] ss:$8 sps:$4 sm:$0xff]   ;;  %p1132_p4 = por %p1131_p3, %p1130_p2 }
  0x38   :  { %181 = vmatprep.subr.bf16.mxu0 %v1004_v9  ;;  %876 = vmatprep.subr.bf16.mxu1 %v1023_v20  ;;  %v1035_v37 = vld [vmem:[#allocation5 + $0x250] ss:$8 sps:$4 sm:$0xff]   ;;  %v1036_v38 = vld [vmem:[#allocation5 + $0x240] ss:$8 sps:$4 sm:$0xff]  }
  0x39   :  { %v75_v43 = vld [vmem:[#allocation7] sm:$0x3]  ;;  %v1037_v0 = vld [vmem:[#allocation5 + $0x230] ss:$8 sps:$4 sm:$0xff]   ;;  %v826_v10 = vld [vmem:[#allocation7 + $0x2] ss:$0 sm:$0xff]  ;;  %p1133_p5 = pnand %p1132_p4, %p1126_p1 }
  0x3a   :  { %v84_v44 = vrot.slane %v75_v43, %v83_v41  ;;  %v80_v45 = vrot.slane %v75_v43, %v79_v42  ;;  %v1038_v1 = vld [vmem:[#allocation5 + $0x220] ss:$8 sps:$4 sm:$0xff]   ;;  %v1039_v2 = vld [vmem:[#allocation5 + $0x210] ss:$8 sps:$4 sm:$0xff]  }
  0x3b   :  { %182 = vmatpush1.bf16.msra.mxu0 %v1006_v11  ;;  %877 = vmatpush3.bf16.msra.mxu1 %v1024_v22  ;;  %v1040_v3 = vld [vmem:[#allocation5 + $0x200] ss:$8 sps:$4 sm:$0xff]   ;;  %v1041_v4 = vld [vmem:[#allocation5 + $0x370] ss:$8 sps:$4 sm:$0xff]  }
  0x3c   :  { %183 = vmatprep.subr.bf16.mxu0 %v1007_v13  ;;  %878 = vmatprep.subr.bf16.mxu1 %v1025_v24  ;;  %v1042_v5 = vld [vmem:[#allocation5 + $0x360] ss:$8 sps:$4 sm:$0xff]   ;;  %v1043_v6 = vld [vmem:[#allocation5 + $0x350] ss:$8 sps:$4 sm:$0xff]  }
  0x3d   :  { %v1044_v7 = vld [vmem:[#allocation5 + $0x340] ss:$8 sps:$4 sm:$0xff]   ;;  %v1045_v8 = vld [vmem:[#allocation5 + $0x330] ss:$8 sps:$4 sm:$0xff]  }
  0x3e   :  { %v1047_v24 = vld [vmem:[#allocation5 + $0x310] ss:$8 sps:$4 sm:$0xff]  }
  0x3f   :  { %184 = vmatpush1.bf16.msra.mxu0 %v1009_v17  ;;  %879 = vmatpush3.bf16.msra.mxu1 %v1026_v27  ;;  %v1050_v27 = vld [vmem:[#allocation5 + $0x460] ss:$8 sps:$4 sm:$0xff]  }
  0x40   :  { %185 = vmatprep.subr.bf16.mxu0 %v1010_v19  ;;  %880 = vmatprep.subr.bf16.mxu1 %v1027_v28  ;;  %v1051_v28 = vld [vmem:[#allocation5 + $0x450] ss:$8 sps:$4 sm:$0xff]  }
  0x43   :  { %186 = vmatpush1.bf16.msra.mxu0 %v1012_v21  ;;  %881 = vmatpush3.bf16.msra.mxu1 %v1028_v29  ;;  %v1052_v29 = vld [vmem:[#allocation5 + $0x440] ss:$8 sps:$4 sm:$0xff]  }
  0x44   :  { %187 = vmatprep.subr.bf16.mxu0 %v1013_v23  ;;  %882 = vmatprep.subr.bf16.mxu1 %v1029_v30  ;;  %v1046_v23 = vld [vmem:[#allocation5 + $0x320] ss:$8 sps:$4 sm:$0xff]   ;;  %v1053_v30 = vld [vmem:[#allocation5 + $0x430] ss:$8 sps:$4 sm:$0xff]  }
  0x47   :  { %188 = vmatpush1.bf16.msra.mxu0 %v1015_v25  ;;  %883 = vmatpush3.bf16.msra.mxu1 %v1030_v31  ;;  %v1048_v25 = vld [vmem:[#allocation5 + $0x300] ss:$8 sps:$4 sm:$0xff]   ;;  %v843_v31 = vld [vmem:[#allocation7 + $0x4] ss:$0 sm:$0xff] }
  0x48   :  { %884 = vmatprep.subr.bf16.mxu1 %v1031_v32  ;;  %919 = vmatprep.subr.bf16.mxu0 %v1161_v35 }
  0x4a   :  { %206 = vmatmul.mubr.bf16.vlgmr.msra.gmra.mxu0 %v1016_v26  ;;  %v1049_v26 = vld [vmem:[#allocation5 + $0x470] ss:$8 sps:$4 sm:$0xff]  }
  0x4b   :  { %885 = vmatpush3.bf16.msra.mxu1 %v1032_v33  ;;  %920 = vmatpush3.bf16.msra.mxu0 %v1033_v34 }
  0x4c   :  { %939 = vmatprep.subr.bf16.mxu1 %v1161_v35  ;;  %921 = vmatprep.subr.bf16.mxu0 %v1161_v35 }
  0x4d   :  { %935 = vmatprep.mubr.msk.bf16.mxu0 %vm1162_vm4, %v1161_v35 }
  0x4f   :  { %922 = vmatpush3.bf16.msra.mxu0 %v1034_v36 }
  0x50   :  { %923 = vmatprep.subr.bf16.mxu0 %v1161_v35 }
  0x53   :  { %924 = vmatpush3.bf16.msra.mxu0 %v1035_v37 }
  0x54   :  { %925 = vmatprep.subr.bf16.mxu0 %v1161_v35 }
  0x57   :  { %926 = vmatpush3.bf16.msra.mxu0 %v1036_v38 }
  0x58   :  { %927 = vmatprep.subr.bf16.mxu0 %v1161_v35 }
  0x5b   :  { %928 = vmatpush3.bf16.msra.mxu0 %v1037_v0 }
  0x5c   :  { %929 = vmatprep.subr.bf16.mxu0 %v1161_v35 }
  0x5f   :  { %930 = vmatpush3.bf16.msra.mxu0 %v1038_v1 }
  0x60   :  { %931 = vmatprep.subr.bf16.mxu0 %v1161_v35 }
  0x63   :  { %932 = vmatpush3.bf16.msra.mxu0 %v1039_v2 }
  0x64   :  { %933 = vmatprep.subr.bf16.mxu0 %v1161_v35 }
  0x67   :  { %934 = vmatpush3.bf16.msra.mxu0 %v1040_v3 }
  0x68   :  { %959 = vmatprep.subr.bf16.mxu0 %v1161_v35 }
 0x10a   :  { %v207_v46 = vpop.f32.mrf.mxu0 }
 0x10b   :  { %v208_v49 = vadd.f32 %v207_v46, %v80_v45  ;;  %v1056_v46 = vld [vmem:[#allocation5 + $0x400] ss:$8 sps:$4 sm:$0xff]  }
 0x10c   :  { %v209_v47 = vpop.f32.mrf.mxu0 }
 0x10d   :  { %v210_v48 = vadd.f32 %v209_v47, %v84_v44  ;;  %v220_v56 = vmul.f32 0.01, %v208_v49  ;;  %vm216_vm2 = vcmp.gt.f32.partialorder %v208_v49, 0.0  ;;  %v852_v47 = vld [vmem:[#allocation7 + $0x6] ss:$0 sm:$0xff] }
 0x10e   :  { %v211_v50 = vpop.f32.mrf.mxu0 }
 0x10f   :  { %v212_v51 = vadd.f32 %v211_v50, %v80_v45  ;;  %v221_v53 = vmul.f32 0.01, %v210_v48  ;;  %vm217_vm1 = vcmp.gt.f32.partialorder %v210_v48, 0.0  ;;  %v224_v62 = vsel %vm216_vm2, %v208_v49, %v220_v56  ;;  %v1055_v45 = vld [vmem:[#allocation5 + $0x410] ss:$8 sps:$4 sm:$0xff]  }
 0x110   :  { %v213_v52 = vpop.f32.mrf.mxu0 }
 0x111   :  { %vm218_vm0 = vcmp.gt.f32.partialorder %v212_v51, 0.0  ;;  %v222_v54 = vmul.f32 0.01, %v212_v51  ;;  %v214_v55 = vadd.f32 %v213_v52, %v84_v44  ;;  %v225_v59 = vsel %vm217_vm1, %v210_v48, %v221_v53  ;;  %v1054_v44 = vld [vmem:[#allocation5 + $0x420] ss:$8 sps:$4 sm:$0xff]  }
 0x113   :  { %v223_v57 = vmul.f32 0.01, %v214_v55  ;;  %vm219_vm3 = vcmp.gt.f32.partialorder %v214_v55, 0.0  ;;  %v226_v58 = vsel %vm218_vm0, %v212_v51, %v222_v54 }
 0x114   :  { %v228_v63 = vpack.c.bf16 %v226_v58, %v224_v62 }
 0x115   :  { %v227_v60 = vsel %vm219_vm3, %v214_v55, %v223_v57 }
 0x116   :  { %v229_v61 = vpack.c.bf16 %v227_v60, %v225_v59  ;;  %v861_v59 = vld [vmem:[#allocation7 + $0x8] ss:$0 sm:$0xff] }
 0x118   :  { %399 = vmatprep.mubr.bf16.mxu1 %v229_v61 }
 0x119   :  { %400 = vmatmul.mubr.bf16.vlgmr.msra.gmra.mxu1 %v228_v63 }
 0x11a   :  { %955 = vmatprep.mubr.msk.bf16.mxu1 %vm1162_vm4, %v1161_v35  ;;  %940 = vmatpush3.bf16.msra.mxu1 %v1041_v4 }
 0x11b   :  { %941 = vmatprep.subr.bf16.mxu1 %v1161_v35 }
 0x11e   :  { %942 = vmatpush3.bf16.msra.mxu1 %v1042_v5 }
 0x11f   :  { %943 = vmatprep.subr.bf16.mxu1 %v1161_v35 }
 0x122   :  { %944 = vmatpush3.bf16.msra.mxu1 %v1043_v6 }
 0x123   :  { %945 = vmatprep.subr.bf16.mxu1 %v1161_v35 }
 0x126   :  { %946 = vmatpush3.bf16.msra.mxu1 %v1044_v7 }
 0x127   :  { %947 = vmatprep.subr.bf16.mxu1 %v1161_v35 }
 0x12a   :  { %948 = vmatpush3.bf16.msra.mxu1 %v1045_v8 }
 0x12b   :  { %949 = vmatprep.subr.bf16.mxu1 %v1161_v35 }
 0x12e   :  { %950 = vmatpush3.bf16.msra.mxu1 %v1046_v23 }
 0x12f   :  { %951 = vmatprep.subr.bf16.mxu1 %v1161_v35 }
 0x132   :  { %952 = vmatpush3.bf16.msra.mxu1 %v1047_v24 }
 0x133   :  { %953 = vmatprep.subr.bf16.mxu1 %v1161_v35 }
 0x136   :  { %954 = vmatpush3.bf16.msra.mxu1 %v1048_v25 }
 0x1d9   :  { %v886_v9 = vpop.f32.mrf.mxu1 }
 0x1db   :  { %v887_v11 = vpop.f32.mrf.mxu1 }
 0x1dc   :  { %v888_v12 = vadd.f32 %v887_v11, %v886_v9 }
 0x1dd   :  { %v889_v13 = vpop.f32.mrf.mxu1 }
 0x1de   :  { %v402_v14 = vadd.f32 %v888_v12, %v826_v10 }
 0x1df   :  { %v890_v15 = vpop.f32.mrf.mxu1 }
 0x1e0   :  { %v891_v16 = vadd.f32 %v890_v15, %v889_v13  ;;  %v410_v17 = vmul.f32 0.01, %v402_v14  ;;  %vm408_vm5 = vcmp.gt.f32.partialorder %v402_v14, 0.0 }
 0x1e2   :  { %v405_v18 = vadd.f32 %v891_v16, %v826_v10  ;;  %v412_v20 = vsel %vm408_vm5, %v402_v14, %v410_v17 }
 0x1e4   :  { %vm409_vm6 = vcmp.gt.f32.partialorder %v405_v18, 0.0  ;;  %v411_v19 = vmul.f32 0.01, %v405_v18 }
 0x1e6   :  { %v413_v21 = vsel %vm409_vm6, %v405_v18, %v411_v19 }
 0x1e7   :  { %v414_v22 = vpack.c.bf16 %v413_v21, %v412_v20 }
 0x1e9   :  { %936 = vmatmul.mubr.bf16.vlgmr.msra.gmra.mxu0 %v414_v22 }
 0x1ea   :  { %975 = vmatprep.mubr.msk.bf16.mxu0 %vm1162_vm4, %v1161_v35  ;;  %960 = vmatpush3.bf16.msra.mxu0 %v1049_v26 }
 0x1eb   :  { %961 = vmatprep.subr.bf16.mxu0 %v1161_v35 }
 0x1ee   :  { %962 = vmatpush3.bf16.msra.mxu0 %v1050_v27 }
 0x1ef   :  { %963 = vmatprep.subr.bf16.mxu0 %v1161_v35 }
 0x1f2   :  { %964 = vmatpush3.bf16.msra.mxu0 %v1051_v28 }
 0x1f3   :  { %965 = vmatprep.subr.bf16.mxu0 %v1161_v35 }
 0x1f6   :  { %966 = vmatpush3.bf16.msra.mxu0 %v1052_v29 }
 0x1f7   :  { %967 = vmatprep.subr.bf16.mxu0 %v1161_v35 }
 0x1fa   :  { %968 = vmatpush3.bf16.msra.mxu0 %v1053_v30 }
 0x1fb   :  { %969 = vmatprep.subr.bf16.mxu0 %v1161_v35 }
 0x1fe   :  { %970 = vmatpush3.bf16.msra.mxu0 %v1054_v44 }
 0x1ff   :  { %971 = vmatprep.subr.bf16.mxu0 %v1161_v35 }
 0x202   :  { %972 = vmatpush3.bf16.msra.mxu0 %v1055_v45 }
 0x203   :  { %973 = vmatprep.subr.bf16.mxu0 %v1161_v35 }
 0x206   :  { %974 = vmatpush3.bf16.msra.mxu0 %v1056_v46 }
 0x2a9   :  { %v522_v32 = vpop.f32.mrf.mxu0 }
 0x2aa   :  { %v523_v33 = vadd.f32 %v843_v31, %v522_v32 }
 0x2ab   :  { %v937_v34 = vpop.f32.mrf.mxu0 }
 0x2ac   :  { %v531_v37 = vmul.f32 0.01, %v523_v33  ;;  %vm529_vm7 = vcmp.gt.f32.partialorder %v523_v33, 0.0 }
 0x2ad   :  { %v525_v36 = vpop.f32.mrf.mxu0 }
 0x2ae   :  { %v526_v38 = vadd.f32 %v843_v31, %v525_v36  ;;  %v533_v41 = vsel %vm529_vm7, %v523_v33, %v531_v37 }
 0x2af   :  { %v938_v39 = vpop.f32.mrf.mxu0 }
 0x2b0   :  { %vm530_vm8 = vcmp.gt.f32.partialorder %v526_v38, 0.0  ;;  %v532_v40 = vmul.f32 0.01, %v526_v38 }
 0x2b2   :  { %v534_v42 = vsel %vm530_vm8, %v526_v38, %v532_v40 }
 0x2b3   :  { %v535_v43 = vpack.c.bf16 %v534_v42, %v533_v41 }
 0x2b5   :  { %956 = vmatmul.mubr.bf16.vlgmr.msra.gmra.mxu1 %v535_v43 }
 0x375   :  { %v643_v48 = vpop.f32.mrf.mxu1 }
 0x376   :  { %v644_v49 = vadd.f32 %v852_v47, %v643_v48 }
 0x377   :  { %v957_v50 = vpop.f32.mrf.mxu1 }
 0x378   :  { %v652_v52 = vmul.f32 0.01, %v644_v49  ;;  %vm650_vm9 = vcmp.gt.f32.partialorder %v644_v49, 0.0 }
 0x379   :  { %v646_v51 = vpop.f32.mrf.mxu1 }
 0x37a   :  { %v647_v53 = vadd.f32 %v852_v47, %v646_v51  ;;  %v654_v56 = vsel %vm650_vm9, %v644_v49, %v652_v52 }
 0x37b   :  { %v958_v54 = vpop.f32.mrf.mxu1 }
 0x37c   :  { %vm651_vm10 = vcmp.gt.f32.partialorder %v647_v53, 0.0  ;;  %v653_v55 = vmul.f32 0.01, %v647_v53 }
 0x37e   :  { %v655_v57 = vsel %vm651_vm10, %v647_v53, %v653_v55 }
 0x37f   :  { %v656_v58 = vpack.c.bf16 %v655_v57, %v654_v56 }
 0x381   :  { %976 = vmatmul.mubr.bf16.vlgmr.msra.gmra.mxu0 %v656_v58 }
 0x441   :  { %v764_v60 = vpop.f32.mrf.mxu0 }
 0x442   :  { %v765_v35 = vadd.f32 %v861_v59, %v764_v60 }
 0x443   :  { %v977_v61 = vpop.f32.mrf.mxu0 }
 0x444   :  { %771 = vmax.xlane.f32.xlu0 %v765_v35 }
 0x445   :  { %v767_v62 = vpop.f32.mrf.mxu0 }
 0x446   :  { %v768_v63 = vadd.f32 %v861_v59, %v767_v62 }
 0x447   :  { %v978_v0 = vpop.f32.mrf.mxu0 }
 0x448   :  { %773 = vmax.xlane.f32.xlu0 %v768_v63 }
 0x4cd   :  { %v772_v1 = vpop.xlane.xlu0 %771 }
 0x4ce   :  { %v775_v2 = vsub.f32 %v765_v35, %v772_v1 }
 0x4d0   :  { %v777_v3 = vmul.f32 1.442695, %v775_v2 }
 0x4d1   :  { %v774_v4 = vpop.xlane.xlu0 %773 }
 0x4d2   :  { %1057 = vpow2.f32 %v777_v3  ;;  %v776_v5 = vsub.f32 %v768_v63, %v774_v4 }
 0x4d4   :  { %v779_v6 = vmul.f32 1.442695, %v776_v5 }
 0x4d6   :  { %1059 = vpow2.f32 %v779_v6 }
 0x4df   :  { %v1058_v7 = vpop.eup %1057 }
 0x4e0   :  { %781 = vadd.xlane.f32.xlu1 %v1058_v7 }
 0x4e3   :  { %v1060_v8 = vpop.eup %1059 }
 0x4e4   :  { %783 = vadd.xlane.f32.xlu1 %v1060_v8 }
 0x569   :  { %v782_v9 = vpop.xlane.xlu1 %781 }
 0x56a   :  { %1061 = vrcp.f32 %v782_v9 }
 0x56d   :  { %v784_v10 = vpop.xlane.xlu1 %783 }
 0x56e   :  { %1063 = vrcp.f32 %v784_v10 }
 0x577   :  { %v1062_v11 = vpop.eup %1061 }
 0x578   :  { %v786_v12 = vmul.f32 %v1062_v11, %v1058_v7 }
 0x57a   :  { %789 = vst [vmem:[#allocation8] sm:$0xff] %v786_v12 }
 0x57b   :  { %v1064_v13 = vpop.eup %1063 }
 0x57c   :  { %v788_v14 = vmul.f32 %v1064_v13, %v1060_v8 }
 0x57e   :  { %790 = vst [vmem:[#allocation8 + $0x8] sm:$0xff] %v788_v14 }
 0x57f   :  { %1136 = shalt.err (!%p1133_p5)
}
 0x580   :  { %802 = dma.vmem_to_hbm [thread:$0]  %s797_s2, 256, %s1235_s3, [#allocation4], %s1152_s15, %s1152_s15, %s1153_s16  }
 0x581   :  { %1149 = dma.done.wait [#allocation4], 256  }
 0x582   :  { %1150 = vsyncadd [#allocation4], 4294967040 }
 0x583   :  { %806 = vsyncpa [#allocation3], 1 }
 0x584   :  { %807 = vsyncpa [#allocation6], 1 }
 0x585   :  { %808 = vsyncpa [#allocation4], 1 }

</bundles_post_ra>
